<compile_context>
chip_gen: v6e
topology: v6e:2x2x1
jax: 0.10.0
libtpu: 0.0.40
codegen_flags: <defaults>
</compile_context>

<pallas_src>
import jax
import jax.numpy as jnp
from jax.experimental import pallas as pl
from jax.experimental.pallas import tpu as pltpu


# ----------------------------- Pallas kernel -------------------------------

def _double_kernel(x_ref, o_ref):
    # out = x + x  (identity blocks + identity residual add)
    x = x_ref[...]
    o_ref[...] = x + x


# ------------------------------ wrapper -------------------------------------

_SMALL_BYTES = 64 * 1024            # below this, XLA's fused add beats launch overhead
_TARGET_BLOCK_BYTES = 2 * 1024 * 1024   # ~2 MiB/block; x2 buffers x (in+out) = 8 MiB VMEM


def _round_up(v, m):
    return ((v + m - 1) // m) * m


def _pick_width(total):
    """Largest lane-dense width (multiple of 128) that divides the element count."""
    for w in (4096, 2048, 1024, 512, 256, 128):
        if total % w == 0:
            return w
    return None


def residual_block_forward(x, in_channels, out_channels):
    """ResidualBlock.forward with Identity blocks/shortcut: out = x + x.

    `should_apply_shortcut` only swaps in another Identity, so the result is
    independent of in_channels/out_channels.
    """
    del in_channels, out_channels  # semantics do not depend on them (Identity either way)

    total = x.size
    itemsize = jnp.dtype(x.dtype).itemsize
    width = _pick_width(total)

    # Small or ragged tensors: kernel launch + pipeline prologue exceeds the
    # cost of the elementwise op, and ragged sizes would need a pad round-trip
    # (an extra full HBM pass).  Let XLA fuse the add instead.
    if total * itemsize < _SMALL_BYTES or width is None:
        return x + x

    rows = total // width

    # Native sublane packing: 8 rows for 32-bit, 16 for bf16/fp16, 32 for int8/fp8.
    sublane = max(8, 32 // itemsize)

    # Target ~2 MiB per block (well past the tiling-curve knee, and
    # 2 buffers x (in + out) = 4x block bytes = 8 MiB, safely inside v7x's
    # 32 MiB scoped VMEM and v5e's 16 MiB default).
    target_rows = max(sublane,
                      (_TARGET_BLOCK_BYTES // (width * itemsize)) // sublane * sublane)

    if rows <= target_rows:
        if rows >= 2 * sublane:
            # Split so the grid has >= 2 parallel steps (v7x has 2 TensorCores).
            block_rows = _round_up((rows + 1) // 2, sublane)
        else:
            # Single block equal to the full dim (allowed even if not 8-aligned).
            block_rows = rows
    else:
        block_rows = target_rows

    grid = (pl.cdiv(rows, block_rows),)
    x2d = x.reshape(rows, width)

    out2d = pl.pallas_call(
        _double_kernel,
        out_shape=jax.ShapeDtypeStruct((rows, width), x.dtype),
        grid_spec=pltpu.PrefetchScalarGridSpec(
            num_scalar_prefetch=0,
            grid=grid,
            in_specs=[pl.BlockSpec((block_rows, width), lambda i: (i, 0))],
            out_specs=pl.BlockSpec((block_rows, width), lambda i: (i, 0)),
        ),
        compiler_params=pltpu.CompilerParams(
            dimension_semantics=("parallel",),
            vmem_limit_bytes=32 * 1024 * 1024,
        ),
    )(x2d)

    return out2d.reshape(x.shape)


# ------------------------------- test ---------------------------------------

if __name__ == "__main__":
    key = jax.random.PRNGKey(0)
    k_small, k_big = jax.random.split(key)

    C = 4  # base channels, consistent with a small Encoder config

    # 1) Larger NCHW tensor -> exercises the Pallas kernel path.
    x_big = jax.random.normal(k_big, (2, 16, 64, 64), dtype=jnp.float32)
    out_big = jax.block_until_ready(residual_block_forward(x_big, 16, 16))
    assert out_big.shape == x_big.shape
    assert jnp.allclose(out_big, x_big + x_big, atol=1e-6, rtol=1e-6)

    # bf16 input through the kernel path (16-row sublane packing).
    x_bf16 = x_big.astype(jnp.bfloat16)
    out_bf16 = jax.block_until_ready(residual_block_forward(x_bf16, 16, 16))
    assert jnp.allclose(out_bf16.astype(jnp.float32),
                        (x_bf16 + x_bf16).astype(jnp.float32))

    # 2) Small NCHW tensor (as in the module's typical activations) -> fast path.
    x_small = jax.random.normal(k_small, (2, C, 16, 16), dtype=jnp.float32)
    out_small = jax.block_until_ready(residual_block_forward(x_small, C, C))
    assert out_small.shape == x_small.shape
    assert jnp.allclose(out_small, x_small + x_small, atol=1e-6, rtol=1e-6)

    print("KERNEL_OK")
</pallas_src>

<mosaic_0001>
module attributes {stable_mosaic.version = 11 : i64} {
  func.func @_double_kernel(%arg0: i32, %arg1: memref<16x4096xf32, #tpu.memory_space<vmem>>, %arg2: memref<16x4096xf32, #tpu.memory_space<vmem>>) attributes {dimension_semantics = [#tpu.dimension_semantics<parallel>], iteration_bounds = array<i64: 2>, scalar_prefetch = 0 : i64, scratch_operands = 0 : i64, tpu.core_type = #tpu.core_type<tc>, window_params = [{transform_indices = @transform_0, window_bounds = array<i64: 16, 4096>}, {transform_indices = @transform_1, window_bounds = array<i64: 16, 4096>}]} {
    %c0 = arith.constant 0 : index
    %c0_0 = arith.constant 0 : index
    %0 = vector.load %arg1[%c0, %c0_0] : memref<16x4096xf32, #tpu.memory_space<vmem>>, vector<16x4096xf32>
    %1 = arith.addf %0, %0 : vector<16x4096xf32>
    %c0_1 = arith.constant 0 : index
    %c0_2 = arith.constant 0 : index
    %2 = vector.load %arg2[%c0_1, %c0_2] : memref<16x4096xf32, #tpu.memory_space<vmem>>, vector<16x4096xf32>
    tpu.vector_store %arg2[%c0_1, %c0_2], %1 {strides = array<i32>} : memref<16x4096xf32, #tpu.memory_space<vmem>>, vector<16x4096xf32>,
    return
  }
  func.func @transform_0(%arg0: i32) -> (i32, i32) {
    %c0_i32 = arith.constant 0 : i32
    %c0_i32_0 = arith.constant 0 : i32
    return %arg0, %c0_i32 : i32, i32
  }
  func.func @transform_1(%arg0: i32) -> (i32, i32) {
    %c0_i32 = arith.constant 0 : i32
    %c0_i32_0 = arith.constant 0 : i32
    return %arg0, %c0_i32 : i32, i32
  }
}

</mosaic_0001>

<bundles_post_ra>
// kernel: tpu_custom_call.1
= control target key start
LH: loop header
LB: loop body
LE: loop exit
PB: predicated region body
PF: predicated region fallthrough
CT: control target
= control target key end

     0   :  { %6 = vsyncpa [#allocation3], 0  ;;  %s885_s0 = inlined_call_operand.hbm [shape: f32[32,4096], index: 0, kind: input, shape index: {}]   ;;  %s886_s1 = inlined_call_operand.hbm [shape: f32[32,4096], index: 1, kind: output, shape index: {}]  }
   0x1   :  { %8 = vsyncpa [#allocation3 + $0x1], 0 }
   0x2   :  { %9 = vsyncpa [#allocation4], 0 }
   0x3   :  { %11 = vsyncpa [#allocation4 + $0x1], 0  ;;  %s598_s6 = smov 0   ;;  %s600_s7 = smov 0  }
   0x4   :  { %s602_s8 = smov 0   ;;  %s604_s9 = smov 0  }
   0x5 LB: > { %s619_s10 = sadd.s32 4294967295, %s580_s9   ;;  %s418_s11 = sadd.s32 4294967294, %s580_s9   ;;  %s580_s9 = sphi %s604_s9, %s901_s9   ;;  %s576_s8 = sphi %s602_s8, %s900_s8   ;;  %s572_s7 = sphi %s600_s7, %s899_s7   ;;  %s568_s6 = sphi %s598_s6, %s898_s6  }
   0x6   : > { %s623_s12 = sadd.s32 1, %s580_s9   ;;  %s24_s13 = sadd.s32 1, %s576_s8 }
   0x7   : > { %s21_s14 = ssub.s32 %s580_s9, %s623_s12  ;;  %p31_p0 = scmp.ne.s32.totalorder %s576_s8, %s572_s7 }
   0x8   : > { %p22_p1 = scmp.eq.s32.totalorder %s21_s14, 0  ;;  %p32_p2 = scmp.eq.s32.totalorder %s580_s9, 0 }
   0x9   : > { %p37_p3 = scmp.ne.s32.totalorder %s572_s7, %s568_s6  ;;  %p38_p4 = scmp.eq.s32.totalorder %s619_s10, 0 }
   0xa   : > { %s635_s15 = scalar_select %p22_p1, %s576_s8, %s24_s13  }
   0xb   : > { %p637_p5 = por %p32_p2, %p31_p0  ;;  %p641_p6 = por %p38_p4, %p37_p3 }
   0xc   : > { %p61_p7 = scmp.eq.s32.totalorder %s619_s10, 1  ;;  %p67_p8 = scmp.eq.s32.totalorder %s418_s11, 1 }
   0xd   : > { %s890_s17 = scalar_select %p641_p6, 1, 0 }
   0xe   : > { %p450_p10 = scmp.lt.s32.totalorder %s580_s9, 2  ;;  %p648_p11 = por %p61_p7, %p31_p0 }
   0xf   : > { %p652_p12 = por %p67_p8, %p37_p3  ;;  %s87_s20 = sand.u32 1, %s576_s8  }
  0x10   : > { %s891_s18 = scalar_select %p648_p11, 1, 0 }
  0x11   : > { %s892_s19 = scalar_select %p652_p12, 1, 0 }
  0x12   : > { %s435_s21 = sshll.u32 %s580_s9, 13  ;;  %s421_s22 = sshll.u32 %s87_s20, 9 }
  0x13   : > { %s661_s25 = scalar_lea.hbm %s885_s0, %s435_s21  ;;  %s91_s26 = scalar_lea.vmem [#allocation2], %s421_s22 }
  0x14   : > { %s99_s27 = sshll.u32 %s91_s26, 4  ;;  %p665_p13 = pnand %p450_p10, %p637_p5  ;;  %s669_s27 = int_to_ptr.vmem [resolvable:$true] %s99_s27 }
  0x15   : > { %s671_s29 = scalar_lea.sflag [#allocation3], %s87_s20  ;;  %s488_s30 = scalar_lea.hbm %s661_s25, 8192 }
  0x16   : > { %p489_p0 = scmp.ne.s32.totalorder %s661_s25, %s488_s30  ;;  %p490_p1 = pneg %p665_p13 }
  0x17   : > { %s493_s4 = scalar_lea.hbm %s885_s0, 16384  ;;  %p494_p4 = scmp.lt.s32.totalorder %s661_s25, %s885_s0 }
  0x18   : > { %p491_p2 = pnand %p490_p1, %p489_p0  ;;  %p495_p5 = scmp.lt.s32.totalorder %s493_s4, %s488_s30 }
  0x1a   : > { %p492_p3 = pneg %p491_p2  ;;  %p496_p7 = por %p495_p5, %p494_p4 }
  0x1c   : > { %p497_p8 = pnand %p496_p7, %p492_p3 }
  0x1e   : > { %500 = shalt.err (!%p497_p8)
}
  0x1f   : > { %s501_s13 = scalar_lea.vmem %s669_s27, 8192  ;;  %s582_s14 = smov [#allocation2]  }
  0x20   : > { %p502_p10 = scmp.ne.s32.totalorder %s669_s27, %s501_s13  ;;  %s506_s16 = sshll.u32 %s582_s14, 4  ;;  %s507_s16 = int_to_ptr.vmem [resolvable:$false] %s506_s16 }
  0x21   : > { %s508_s20 = scalar_lea.vmem %s507_s16, 16384  ;;  %p509_p2 = scmp.lt.s32.totalorder %s669_s27, %s507_s16 }
  0x22   : > { %p504_p9 = pnand %p502_p10, %p490_p1  ;;  %p510_p12 = scmp.lt.s32.totalorder %s508_s20, %s501_s13 }
  0x24   : > { %p505_p0 = pneg %p504_p9  ;;  %p511_p11 = por %p510_p12, %p509_p2 }
  0x26   : > { %p512_p6 = pnand %p511_p11, %p505_p0 }
  0x28   : > { %515 = shalt.err (!%p512_p6)
}
  0x29   : > { %s583_s21 = smov 4096   ;;  %s584_s22 = smov 256  }
  0x2a   : > { %445 = dma.hbm_to_vmem [thread:$0]  (!%p665_p13), %s661_s25, 8192, %s669_s27, %s671_s29, %s583_s21, %s583_s21, %s584_s22  }
  0x2b   : > { %p425_p9 = scmp.ge.s32.totalorder %s580_s9, 1  ;;  %p107_p1 = scmp.lt.s32.totalorder %s580_s9, 3 }
  0x2d   : > { %p108_p3 = pnand %p425_p9, %p107_p1 }
  0x2e   : > { %s695_s23 = sand.u32 (!%p108_p3), 1, %s572_s7   ;;  %p894_p6 = scmp.ne.s32.totalorder (!%p108_p3), %s890_s17, 0 }
  0x2f   : > { %111 = sbr.rel (%p108_p3) target bundleno = 101 (0x65), region = 24  ;;  %s426_s24 = sshll.u32 (!%p108_p3), %s695_s23, 9 }
  0x30   : > { %s114_s26 = scalar_lea.sflag (!%p108_p3), [#allocation3], %s695_s23  ;;  %s699_s30 = scalar_lea.vmem (!%p108_p3), [#allocation2], %s426_s24 }
  0x34   : > { %559 = dma.done.wait (%p894_p6), %s114_s26, 8192  }
  0x35   : > { %561 = vsyncadd (%p894_p6), %s114_s26, 4294959104  ;;  %v138_v0 = vld [vmem:[%s699_s30] sm:$0xff]  ;;  %v139_v1 = vld [vmem:[%s699_s30 + $0x8] sm:$0xff]  ;;  %s714_s17 = scalar_lea.vmem [#allocation5], %s426_s24  ;;  %s437_s25 = sshll.u32 %s619_s10, 13 }
  0x36   : > { %v140_v2 = vld [vmem:[%s699_s30 + $0x10] sm:$0xff]  ;;  %v202_v3 = vadd.f32 %v138_v0, %v138_v0  ;;  %v203_v4 = vadd.f32 %v139_v1, %v139_v1  ;;  %v141_v6 = vld [vmem:[%s699_s30 + $0x18] sm:$0xff]  ;;  %v142_v7 = vld [vmem:[%s699_s30 + $0x20] sm:$0xff]  ;;  %s345_s27 = sshll.u32 %s714_s17, 4  ;;  %s833_s29 = scalar_lea.hbm %s886_s1, %s437_s25  ;;  %s835_s27 = int_to_ptr.vmem [resolvable:$true] %s345_s27 }
  0x37   : > { %v204_v5 = vadd.f32 %v140_v2, %v140_v2  ;;  %v143_v8 = vld [vmem:[%s699_s30 + $0x28] sm:$0xff]  ;;  %v205_v9 = vadd.f32 %v141_v6, %v141_v6  ;;  %v206_v10 = vadd.f32 %v142_v7, %v142_v7  ;;  %v144_v12 = vld [vmem:[%s699_s30 + $0x30] sm:$0xff]  ;;  %v145_v13 = vld [vmem:[%s699_s30 + $0x38] sm:$0xff]  ;;  %s331_s2 = scalar_lea.sflag [#allocation4], %s695_s23  ;;  %s516_s3 = scalar_lea.vmem %s835_s27, 8192 }
  0x38   : > { %v207_v11 = vadd.f32 %v143_v8, %v143_v8  ;;  %v146_v14 = vld [vmem:[%s699_s30 + $0x40] sm:$0xff]  ;;  %266 = vst [vmem:[%s714_s17] sm:$0xff] %v202_v3  ;;  %267 = vst [vmem:[%s714_s17 + $0x8] sm:$0xff] %v203_v4  ;;  %v208_v15 = vadd.f32 %v144_v12, %v144_v12  ;;  %v209_v16 = vadd.f32 %v145_v13, %v145_v13  ;;  %v147_v18 = vld [vmem:[%s699_s30 + $0x48] sm:$0xff]  ;;  %p517_p11 = scmp.ne.s32.totalorder %s835_s27, %s516_s3  ;;  %p895_p12 = scmp.ne.s32.totalorder %s891_s18, 0 }
  0x39   : > { %268 = vst [vmem:[%s714_s17 + $0x10] sm:$0xff] %v204_v5  ;;  %v210_v17 = vadd.f32 %v146_v14, %v146_v14  ;;  %v148_v19 = vld [vmem:[%s699_s30 + $0x50] sm:$0xff]  ;;  %v149_v20 = vld [vmem:[%s699_s30 + $0x58] sm:$0xff]  ;;  %269 = vst [vmem:[%s714_s17 + $0x18] sm:$0xff] %v205_v9  ;;  %v211_v21 = vadd.f32 %v147_v18, %v147_v18  ;;  %s585_s4 = smov [#allocation5]  }
  0x3a   : > { %270 = vst [vmem:[%s714_s17 + $0x20] sm:$0xff] %v206_v10  ;;  %271 = vst [vmem:[%s714_s17 + $0x28] sm:$0xff] %v207_v11  ;;  %v212_v22 = vadd.f32 %v148_v19, %v148_v19  ;;  %v213_v23 = vadd.f32 %v149_v20, %v149_v20  ;;  %v150_v24 = vld [vmem:[%s699_s30 + $0x60] sm:$0xff]  ;;  %v151_v25 = vld [vmem:[%s699_s30 + $0x68] sm:$0xff]  ;;  %p518_p13 = pnand %p517_p11, %p895_p12  ;;  %s520_s5 = sshll.u32 %s585_s4, 4  ;;  %s521_s5 = int_to_ptr.vmem [resolvable:$false] %s520_s5 }
  0x3b   : > { %v152_v26 = vld [vmem:[%s699_s30 + $0x70] sm:$0xff]  ;;  %272 = vst [vmem:[%s714_s17 + $0x30] sm:$0xff] %v208_v15  ;;  %273 = vst [vmem:[%s714_s17 + $0x38] sm:$0xff] %v209_v16  ;;  %v214_v27 = vadd.f32 %v150_v24, %v150_v24  ;;  %v215_v28 = vadd.f32 %v151_v25, %v151_v25  ;;  %v153_v30 = vld [vmem:[%s699_s30 + $0x78] sm:$0xff]  ;;  %s522_s11 = scalar_lea.vmem %s521_s5, 16384  ;;  %p523_p5 = scmp.lt.s32.totalorder %s835_s27, %s521_s5 }
  0x3c   : > { %274 = vst [vmem:[%s714_s17 + $0x40] sm:$0xff] %v210_v17  ;;  %v216_v29 = vadd.f32 %v152_v26, %v152_v26  ;;  %v154_v31 = vld [vmem:[%s699_s30 + $0x80] sm:$0xff]  ;;  %v155_v32 = vld [vmem:[%s699_s30 + $0x88] sm:$0xff]  ;;  %275 = vst [vmem:[%s714_s17 + $0x48] sm:$0xff] %v211_v21  ;;  %v217_v33 = vadd.f32 %v153_v30, %v153_v30  ;;  %p519_p4 = pneg %p518_p13  ;;  %p524_p7 = scmp.lt.s32.totalorder %s522_s11, %s516_s3 }
  0x3d   : > { %276 = vst [vmem:[%s714_s17 + $0x50] sm:$0xff] %v212_v22  ;;  %277 = vst [vmem:[%s714_s17 + $0x58] sm:$0xff] %v213_v23  ;;  %v218_v34 = vadd.f32 %v154_v31, %v154_v31  ;;  %v219_v35 = vadd.f32 %v155_v32, %v155_v32  ;;  %v156_v36 = vld [vmem:[%s699_s30 + $0x90] sm:$0xff]  ;;  %v157_v37 = vld [vmem:[%s699_s30 + $0x98] sm:$0xff] }
  0x3e   : > { %v158_v38 = vld [vmem:[%s699_s30 + $0xa0] sm:$0xff]  ;;  %278 = vst [vmem:[%s714_s17 + $0x60] sm:$0xff] %v214_v27  ;;  %279 = vst [vmem:[%s714_s17 + $0x68] sm:$0xff] %v215_v28  ;;  %v220_v39 = vadd.f32 %v156_v36, %v156_v36  ;;  %v221_v40 = vadd.f32 %v157_v37, %v157_v37  ;;  %v159_v42 = vld [vmem:[%s699_s30 + $0xa8] sm:$0xff]  ;;  %p525_p8 = por %p524_p7, %p523_p5 }
  0x3f   : > { %280 = vst [vmem:[%s714_s17 + $0x70] sm:$0xff] %v216_v29  ;;  %v222_v41 = vadd.f32 %v158_v38, %v158_v38  ;;  %v160_v43 = vld [vmem:[%s699_s30 + $0xb0] sm:$0xff]  ;;  %v161_v44 = vld [vmem:[%s699_s30 + $0xb8] sm:$0xff]  ;;  %281 = vst [vmem:[%s714_s17 + $0x78] sm:$0xff] %v217_v33  ;;  %v223_v45 = vadd.f32 %v159_v42, %v159_v42 }
  0x40   : > { %282 = vst [vmem:[%s714_s17 + $0x80] sm:$0xff] %v218_v34  ;;  %283 = vst [vmem:[%s714_s17 + $0x88] sm:$0xff] %v219_v35  ;;  %v224_v46 = vadd.f32 %v160_v43, %v160_v43  ;;  %v225_v47 = vadd.f32 %v161_v44, %v161_v44  ;;  %v162_v48 = vld [vmem:[%s699_s30 + $0xc0] sm:$0xff]  ;;  %v163_v49 = vld [vmem:[%s699_s30 + $0xc8] sm:$0xff]  ;;  %p526_p10 = pnand %p525_p8, %p519_p4 }
  0x41   : > { %v164_v50 = vld [vmem:[%s699_s30 + $0xd0] sm:$0xff]  ;;  %284 = vst [vmem:[%s714_s17 + $0x90] sm:$0xff] %v220_v39  ;;  %285 = vst [vmem:[%s714_s17 + $0x98] sm:$0xff] %v221_v40  ;;  %v226_v51 = vadd.f32 %v162_v48, %v162_v48  ;;  %v227_v52 = vadd.f32 %v163_v49, %v163_v49  ;;  %v165_v54 = vld [vmem:[%s699_s30 + $0xd8] sm:$0xff] }
  0x42   : > { %286 = vst [vmem:[%s714_s17 + $0xa0] sm:$0xff] %v222_v41  ;;  %v228_v53 = vadd.f32 %v164_v50, %v164_v50  ;;  %v166_v55 = vld [vmem:[%s699_s30 + $0xe0] sm:$0xff]  ;;  %v167_v56 = vld [vmem:[%s699_s30 + $0xe8] sm:$0xff]  ;;  %287 = vst [vmem:[%s714_s17 + $0xa8] sm:$0xff] %v223_v45  ;;  %v229_v57 = vadd.f32 %v165_v54, %v165_v54 }
  0x43   : > { %288 = vst [vmem:[%s714_s17 + $0xb0] sm:$0xff] %v224_v46  ;;  %289 = vst [vmem:[%s714_s17 + $0xb8] sm:$0xff] %v225_v47  ;;  %v230_v58 = vadd.f32 %v166_v55, %v166_v55  ;;  %v231_v59 = vadd.f32 %v167_v56, %v167_v56  ;;  %v168_v60 = vld [vmem:[%s699_s30 + $0xf0] sm:$0xff]  ;;  %v169_v61 = vld [vmem:[%s699_s30 + $0xf8] sm:$0xff] }
  0x44   : > { %v170_v62 = vld [vmem:[%s699_s30 + $0x100] sm:$0xff]  ;;  %290 = vst [vmem:[%s714_s17 + $0xc0] sm:$0xff] %v226_v51  ;;  %291 = vst [vmem:[%s714_s17 + $0xc8] sm:$0xff] %v227_v52  ;;  %v232_v63 = vadd.f32 %v168_v60, %v168_v60  ;;  %v233_v0 = vadd.f32 %v169_v61, %v169_v61  ;;  %v171_v2 = vld [vmem:[%s699_s30 + $0x108] sm:$0xff] }
  0x45   : > { %292 = vst [vmem:[%s714_s17 + $0xd0] sm:$0xff] %v228_v53  ;;  %v234_v1 = vadd.f32 %v170_v62, %v170_v62  ;;  %v172_v3 = vld [vmem:[%s699_s30 + $0x110] sm:$0xff]  ;;  %v173_v4 = vld [vmem:[%s699_s30 + $0x118] sm:$0xff]  ;;  %293 = vst [vmem:[%s714_s17 + $0xd8] sm:$0xff] %v229_v57  ;;  %v235_v5 = vadd.f32 %v171_v2, %v171_v2 }
  0x46   : > { %294 = vst [vmem:[%s714_s17 + $0xe0] sm:$0xff] %v230_v58  ;;  %295 = vst [vmem:[%s714_s17 + $0xe8] sm:$0xff] %v231_v59  ;;  %v236_v6 = vadd.f32 %v172_v3, %v172_v3  ;;  %v237_v7 = vadd.f32 %v173_v4, %v173_v4  ;;  %v174_v8 = vld [vmem:[%s699_s30 + $0x120] sm:$0xff]  ;;  %v175_v9 = vld [vmem:[%s699_s30 + $0x128] sm:$0xff] }
  0x47   : > { %v176_v10 = vld [vmem:[%s699_s30 + $0x130] sm:$0xff]  ;;  %296 = vst [vmem:[%s714_s17 + $0xf0] sm:$0xff] %v232_v63  ;;  %297 = vst [vmem:[%s714_s17 + $0xf8] sm:$0xff] %v233_v0  ;;  %v238_v11 = vadd.f32 %v174_v8, %v174_v8  ;;  %v239_v12 = vadd.f32 %v175_v9, %v175_v9  ;;  %v177_v14 = vld [vmem:[%s699_s30 + $0x138] sm:$0xff] }
  0x48   : > { %298 = vst [vmem:[%s714_s17 + $0x100] sm:$0xff] %v234_v1  ;;  %v240_v13 = vadd.f32 %v176_v10, %v176_v10  ;;  %v178_v15 = vld [vmem:[%s699_s30 + $0x140] sm:$0xff]  ;;  %v179_v16 = vld [vmem:[%s699_s30 + $0x148] sm:$0xff]  ;;  %299 = vst [vmem:[%s714_s17 + $0x108] sm:$0xff] %v235_v5  ;;  %v241_v17 = vadd.f32 %v177_v14, %v177_v14 }
  0x49   : > { %300 = vst [vmem:[%s714_s17 + $0x110] sm:$0xff] %v236_v6  ;;  %301 = vst [vmem:[%s714_s17 + $0x118] sm:$0xff] %v237_v7  ;;  %v242_v18 = vadd.f32 %v178_v15, %v178_v15  ;;  %v243_v19 = vadd.f32 %v179_v16, %v179_v16  ;;  %v180_v20 = vld [vmem:[%s699_s30 + $0x150] sm:$0xff]  ;;  %v181_v21 = vld [vmem:[%s699_s30 + $0x158] sm:$0xff] }
  0x4a   : > { %v182_v22 = vld [vmem:[%s699_s30 + $0x160] sm:$0xff]  ;;  %302 = vst [vmem:[%s714_s17 + $0x120] sm:$0xff] %v238_v11  ;;  %303 = vst [vmem:[%s714_s17 + $0x128] sm:$0xff] %v239_v12  ;;  %v244_v23 = vadd.f32 %v180_v20, %v180_v20  ;;  %v245_v24 = vadd.f32 %v181_v21, %v181_v21  ;;  %v183_v26 = vld [vmem:[%s699_s30 + $0x168] sm:$0xff] }
  0x4b   : > { %304 = vst [vmem:[%s714_s17 + $0x130] sm:$0xff] %v240_v13  ;;  %v246_v25 = vadd.f32 %v182_v22, %v182_v22  ;;  %v184_v27 = vld [vmem:[%s699_s30 + $0x170] sm:$0xff]  ;;  %v185_v28 = vld [vmem:[%s699_s30 + $0x178] sm:$0xff]  ;;  %305 = vst [vmem:[%s714_s17 + $0x138] sm:$0xff] %v241_v17  ;;  %v247_v29 = vadd.f32 %v183_v26, %v183_v26 }
  0x4c   : > { %306 = vst [vmem:[%s714_s17 + $0x140] sm:$0xff] %v242_v18  ;;  %307 = vst [vmem:[%s714_s17 + $0x148] sm:$0xff] %v243_v19  ;;  %v248_v30 = vadd.f32 %v184_v27, %v184_v27  ;;  %v249_v31 = vadd.f32 %v185_v28, %v185_v28  ;;  %v186_v32 = vld [vmem:[%s699_s30 + $0x180] sm:$0xff]  ;;  %v187_v33 = vld [vmem:[%s699_s30 + $0x188] sm:$0xff] }
  0x4d   : > { %v188_v34 = vld [vmem:[%s699_s30 + $0x190] sm:$0xff]  ;;  %308 = vst [vmem:[%s714_s17 + $0x150] sm:$0xff] %v244_v23  ;;  %309 = vst [vmem:[%s714_s17 + $0x158] sm:$0xff] %v245_v24  ;;  %v250_v35 = vadd.f32 %v186_v32, %v186_v32  ;;  %v251_v36 = vadd.f32 %v187_v33, %v187_v33  ;;  %v189_v38 = vld [vmem:[%s699_s30 + $0x198] sm:$0xff] }
  0x4e   : > { %310 = vst [vmem:[%s714_s17 + $0x160] sm:$0xff] %v246_v25  ;;  %v252_v37 = vadd.f32 %v188_v34, %v188_v34  ;;  %v190_v39 = vld [vmem:[%s699_s30 + $0x1a0] sm:$0xff]  ;;  %v191_v40 = vld [vmem:[%s699_s30 + $0x1a8] sm:$0xff]  ;;  %311 = vst [vmem:[%s714_s17 + $0x168] sm:$0xff] %v247_v29  ;;  %v253_v41 = vadd.f32 %v189_v38, %v189_v38 }
  0x4f   : > { %312 = vst [vmem:[%s714_s17 + $0x170] sm:$0xff] %v248_v30  ;;  %313 = vst [vmem:[%s714_s17 + $0x178] sm:$0xff] %v249_v31  ;;  %v254_v42 = vadd.f32 %v190_v39, %v190_v39  ;;  %v255_v43 = vadd.f32 %v191_v40, %v191_v40  ;;  %v192_v44 = vld [vmem:[%s699_s30 + $0x1b0] sm:$0xff]  ;;  %v193_v45 = vld [vmem:[%s699_s30 + $0x1b8] sm:$0xff] }
  0x50   : > { %v194_v46 = vld [vmem:[%s699_s30 + $0x1c0] sm:$0xff]  ;;  %314 = vst [vmem:[%s714_s17 + $0x180] sm:$0xff] %v250_v35  ;;  %315 = vst [vmem:[%s714_s17 + $0x188] sm:$0xff] %v251_v36  ;;  %v256_v47 = vadd.f32 %v192_v44, %v192_v44  ;;  %v257_v48 = vadd.f32 %v193_v45, %v193_v45  ;;  %v195_v50 = vld [vmem:[%s699_s30 + $0x1c8] sm:$0xff] }
  0x51   : > { %316 = vst [vmem:[%s714_s17 + $0x190] sm:$0xff] %v252_v37  ;;  %v258_v49 = vadd.f32 %v194_v46, %v194_v46  ;;  %v196_v51 = vld [vmem:[%s699_s30 + $0x1d0] sm:$0xff]  ;;  %v197_v52 = vld [vmem:[%s699_s30 + $0x1d8] sm:$0xff]  ;;  %317 = vst [vmem:[%s714_s17 + $0x198] sm:$0xff] %v253_v41  ;;  %v259_v53 = vadd.f32 %v195_v50, %v195_v50 }
  0x52   : > { %318 = vst [vmem:[%s714_s17 + $0x1a0] sm:$0xff] %v254_v42  ;;  %319 = vst [vmem:[%s714_s17 + $0x1a8] sm:$0xff] %v255_v43  ;;  %v260_v54 = vadd.f32 %v196_v51, %v196_v51  ;;  %v261_v55 = vadd.f32 %v197_v52, %v197_v52  ;;  %v198_v56 = vld [vmem:[%s699_s30 + $0x1e0] sm:$0xff]  ;;  %v199_v57 = vld [vmem:[%s699_s30 + $0x1e8] sm:$0xff] }
  0x53   : > { %v200_v58 = vld [vmem:[%s699_s30 + $0x1f0] sm:$0xff]  ;;  %320 = vst [vmem:[%s714_s17 + $0x1b0] sm:$0xff] %v256_v47  ;;  %321 = vst [vmem:[%s714_s17 + $0x1b8] sm:$0xff] %v257_v48  ;;  %v262_v59 = vadd.f32 %v198_v56, %v198_v56  ;;  %v263_v60 = vadd.f32 %v199_v57, %v199_v57  ;;  %v201_v62 = vld [vmem:[%s699_s30 + $0x1f8] sm:$0xff] }
  0x54   : > { %322 = vst [vmem:[%s714_s17 + $0x1c0] sm:$0xff] %v258_v49  ;;  %v264_v61 = vadd.f32 %v200_v58, %v200_v58  ;;  %323 = vst [vmem:[%s714_s17 + $0x1c8] sm:$0xff] %v259_v53  ;;  %v265_v63 = vadd.f32 %v201_v62, %v201_v62 }
  0x55   : > { %324 = vst [vmem:[%s714_s17 + $0x1d0] sm:$0xff] %v260_v54  ;;  %325 = vst [vmem:[%s714_s17 + $0x1d8] sm:$0xff] %v261_v55 }
  0x56   : > { %326 = vst [vmem:[%s714_s17 + $0x1e0] sm:$0xff] %v262_v59  ;;  %327 = vst [vmem:[%s714_s17 + $0x1e8] sm:$0xff] %v263_v60 }
  0x57   : > { %328 = vst [vmem:[%s714_s17 + $0x1f0] sm:$0xff] %v264_v61  ;;  %329 = vst [vmem:[%s714_s17 + $0x1f8] sm:$0xff] %v265_v63 }
  0x58   : > { %529 = shalt.err (!%p526_p10)
}
  0x59   : > { %s530_s13 = scalar_lea.hbm %s833_s29, 8192  ;;  %s534_s20 = scalar_lea.hbm %s886_s1, 16384 }
  0x5a   : > { %p531_p0 = scmp.ne.s32.totalorder %s833_s29, %s530_s13  ;;  %p535_p1 = scmp.lt.s32.totalorder %s833_s29, %s886_s1 }
  0x5b   : > { %p536_p3 = scmp.lt.s32.totalorder %s534_s20, %s530_s13 }
  0x5c   : > { %p532_p2 = pnand %p531_p0, %p895_p12 }
  0x5d   : > { %p537_p6 = por %p536_p3, %p535_p1 }
  0x5e   : > { %p533_p9 = pneg %p532_p2 }
  0x60   : > { %p538_p11 = pnand %p537_p6, %p533_p9 }
  0x62   : > { %541 = shalt.err (!%p538_p11)
}
  0x63   : > { %s586_s24 = smov 4096   ;;  %s587_s26 = smov 256  }
  0x64   : > { %440 = dma.vmem_to_hbm [thread:$0]  (%p895_p12), %s835_s27, 8192, %s833_s29, %s331_s2, %s586_s24, %s586_s24, %s587_s26  }
  0x65 PF: > { %s360_s30 = sand.u32 1, %s568_s6   ;;  %p896_p13 = scmp.ne.s32.totalorder %s892_s19, 0 }
  0x66   : > { %p897_p4 = scmp.ge.s32.totalorder %s580_s9, 2  ;;  %s361_s17 = scalar_lea.sflag [#allocation4], %s360_s30 }
  0x68   : > { %p447_p5 = pnand %p897_p4, %p896_p13 }
  0x6a   : > { %p448_p7 = pneg %p447_p5 }
  0x6c   : > { %563 = dma.done.wait (%p448_p7), %s361_s17, 8192  }
  0x6d   : > { %565 = vsyncadd (%p448_p7), %s361_s17, 4294959104  ;;  %p14_p8 = scmp.ge.s32.totalorder %s623_s12, 4   ;;  %s898_s6 = smov %s572_s7 }
  0x6e   : > { %s899_s7 = smov %s576_s8  ;;  %s900_s8 = smov %s635_s15 }
  0x6f   : > { %s901_s9 = smov %s623_s12  ;;  %16 = sbr.rel (!%p14_p8) target bundleno = 5 (0x5), region = 69 }
  0x74   :  { %366 = vsyncpa [#allocation3], 1 }
  0x75   :  { %368 = vsyncpa [#allocation3 + $0x1], 1 }
  0x76   :  { %369 = vsyncpa [#allocation4], 1 }
  0x77   :  { %371 = vsyncpa [#allocation4 + $0x1], 1 }

</bundles_post_ra>
